<compile_context>
chip_gen: v7x
topology: tpu7x:2x2x1
jax: 0.10.0
libtpu: 0.0.40
codegen_flags: <defaults>
</compile_context>

<pallas_src>
import math
import functools

import jax
import jax.numpy as jnp
from jax.experimental import pallas as pl
from jax.experimental.pallas import tpu as pltpu

_LANES = 128


def _recip(x):
    """Fast f32 reciprocal: EUP approx rcp + one Newton-Raphson step.

    Approx rcp alone is ~2e-4 relative; one NR step brings it to ~1e-7,
    safely inside the 1e-4 comparison tolerance while keeping the divide
    off the VALU critical path."""
    r = pl.reciprocal(x, approx=True)
    return r * (2.0 - x * r)


def _atan(x):
    """float32-accurate arctan (Cephes atanf-style argument reduction +
    minimax polynomial), built only from elementwise ops Mosaic lowers.
    Uses a single shared reciprocal for the big/mid reduction branches."""
    t3p8 = 2.414213562373095   # tan(3*pi/8)
    tp8 = 0.4142135623730951   # tan(pi/8)
    sgn = jnp.where(x < 0.0, jnp.float32(-1.0), jnp.float32(1.0))
    ax = jnp.abs(x)
    big = ax > t3p8
    mid = jnp.logical_and(ax > tp8, jnp.logical_not(big))
    # One reciprocal shared by the big (1/ax) and mid (1/(ax+1)) branches;
    # den > 1 whenever the small branch is taken, so it is always safe.
    den = jnp.where(big, ax, ax + 1.0)
    r = _recip(den)
    xr = jnp.where(big, -r, jnp.where(mid, (ax - 1.0) * r, ax))
    y0 = jnp.where(big, jnp.float32(math.pi / 2.0),
                   jnp.where(mid, jnp.float32(math.pi / 4.0), jnp.float32(0.0)))
    z = xr * xr
    q = ((8.05374449538e-2 * z - 1.38776856032e-1) * z
         + 1.99777106478e-1) * z - 3.33329491539e-1
    return sgn * (y0 + q * z * xr + xr)


def _iou_loss_kernel(pred_ref, tgt_ref, out_ref, *, loss_type, xyxy, n_valid,
                     reduce_sum, assume_positive_wh):
    # pred_ref / tgt_ref: (4, row_tile, 128) SoA tiles; planes = [x, y, w, h]
    # (or x1, y1, x2, y2 if xyxy).  Each coordinate slab is lane/sublane dense.
    px = pred_ref[0].astype(jnp.float32)
    py = pred_ref[1].astype(jnp.float32)
    pw = pred_ref[2].astype(jnp.float32)
    ph = pred_ref[3].astype(jnp.float32)
    tx = tgt_ref[0].astype(jnp.float32)
    ty = tgt_ref[1].astype(jnp.float32)
    tw = tgt_ref[2].astype(jnp.float32)
    th = tgt_ref[3].astype(jnp.float32)

    if xyxy:
        tl_x = jnp.maximum(px, tx)
        tl_y = jnp.maximum(py, ty)
        br_x = jnp.minimum(pw, tw)
        br_y = jnp.minimum(ph, th)
        area_p = (pw - px) * (ph - py)
        area_g = (tw - tx) * (th - ty)
    else:
        # hoist corner subexpressions, shared with the convex box below
        p_x1 = px - 0.5 * pw
        p_y1 = py - 0.5 * ph
        p_x2 = px + 0.5 * pw
        p_y2 = py + 0.5 * ph
        t_x1 = tx - 0.5 * tw
        t_y1 = ty - 0.5 * th
        t_x2 = tx + 0.5 * tw
        t_y2 = ty + 0.5 * th
        tl_x = jnp.maximum(p_x1, t_x1)
        tl_y = jnp.maximum(p_y1, t_y1)
        br_x = jnp.minimum(p_x2, t_x2)
        br_y = jnp.minimum(p_y2, t_y2)
        area_p = pw * ph
        area_g = tw * th

    iw = jnp.maximum(br_x - tl_x, 0.0)
    ih = jnp.maximum(br_y - tl_y, 0.0)
    area_i = iw * ih
    iou = area_i * _recip(area_p + area_g - area_i + 1e-16)

    if loss_type == "iou":
        loss = 1.0 - iou * iou
    elif loss_type == "giou":
        if xyxy:
            c_tl_x = jnp.minimum(px, tx)
            c_tl_y = jnp.minimum(py, ty)
            c_br_x = jnp.maximum(pw, tw)
            c_br_y = jnp.maximum(ph, th)
        else:
            c_tl_x = jnp.minimum(p_x1, t_x1)
            c_tl_y = jnp.minimum(p_y1, t_y1)
            c_br_x = jnp.maximum(p_x2, t_x2)
            c_br_y = jnp.maximum(p_y2, t_y2)
        area_c = (c_br_x - c_tl_x) * (c_br_y - c_tl_y)
        giou = iou - (area_c - area_i) * _recip(jnp.maximum(area_c, 1e-16))
        loss = 1.0 - jnp.clip(giou, -1.0, 1.0)
    elif loss_type == "ciou":
        # NOTE: the reference module uses xywh-style corner formulas here
        # regardless of `xyxy` — we match that exactly.
        if xyxy:
            c_tl_x = jnp.minimum(px - 0.5 * pw, tx - 0.5 * tw)
            c_tl_y = jnp.minimum(py - 0.5 * ph, ty - 0.5 * th)
            c_br_x = jnp.maximum(px + 0.5 * pw, tx + 0.5 * tw)
            c_br_y = jnp.maximum(py + 0.5 * ph, ty + 0.5 * th)
        else:
            c_tl_x = jnp.minimum(p_x1, t_x1)
            c_tl_y = jnp.minimum(p_y1, t_y1)
            c_br_x = jnp.maximum(p_x2, t_x2)
            c_br_y = jnp.maximum(p_y2, t_y2)
        dcx = c_br_x - c_tl_x
        dcy = c_br_y - c_tl_y
        convex_dis = dcx * dcx + dcy * dcy + 1e-7
        dx = px - tx
        dy = py - ty
        center_dis = dx * dx + dy * dy
        thc = jnp.maximum(th, 1e-7)
        phc = jnp.maximum(ph, 1e-7)
        if assume_positive_wh:
            # atan(tw/thc) - atan(pw/phc) == atan((tw*phc - pw*thc) /
            # (thc*phc + tw*pw)); exact when both aspect ratios are >= 0
            # (true for real boxes and for the 1.0-padded lanes).
            d = _atan((tw * phc - pw * thc) * _recip(thc * phc + tw * pw))
        else:
            d = _atan(tw * _recip(thc)) - _atan(pw * _recip(phc))
        v = (4.0 / (math.pi ** 2)) * d * d
        alpha = v * _recip(1.0 + 1e-7 - iou + v)  # no-grad in torch; same fwd value
        ciou = iou - (center_dis * _recip(convex_dis) + alpha * v)
        loss = 1.0 - jnp.clip(ciou, -1.0, 1.0)
    else:
        # TODO(synk): 'wiou' keeps a host-side running mean (self.iou_mean,
        # updated via .item()) — a stateful side effect with no clean Pallas
        # equivalent; not implemented.
        raise NotImplementedError(f"loss_type={loss_type!r} not implemented in kernel")

    if reduce_sum:
        # In-kernel reduction: per-lane partial sums, padded lanes masked
        # exactly, accumulated in the resident (1, 128) output block.
        step = pl.program_id(0)
        rows = loss.shape[0]
        row_id = jax.lax.broadcasted_iota(jnp.int32, loss.shape, 0) + step * rows
        lane_id = jax.lax.broadcasted_iota(jnp.int32, loss.shape, 1)
        box_id = row_id * _LANES + lane_id
        masked = jnp.where(box_id < n_valid, loss, 0.0)
        partial = jnp.sum(masked, axis=0, keepdims=True)  # (1, 128) XLU reduce

        @pl.when(step == 0)
        def _():
            out_ref[...] = jnp.zeros_like(out_ref)

        out_ref[...] += partial
    else:
        out_ref[...] = loss


def iou_loss(pred, target, *, loss_type="ciou", reduction="none", xyxy=False,
             row_tile=512, input_dtype=None, assume_positive_wh=True):
    """Pallas implementation of IOUloss.forward. pred/target: (..., 4).

    input_dtype: optional narrower storage dtype (e.g. jnp.bfloat16) for the
    kernel inputs; math stays float32 inside the kernel.
    """
    pred = jnp.asarray(pred, jnp.float32).reshape(-1, 4)
    target = jnp.asarray(target, jnp.float32).reshape(-1, 4)
    assert pred.shape[0] == target.shape[0]
    n = pred.shape[0]

    if n == 0:
        if reduction == "mean":
            return jnp.float32(jnp.nan)
        if reduction == "sum":
            return jnp.float32(0.0)
        return jnp.zeros((0,), jnp.float32)

    # --- tile selection --------------------------------------------------
    rows = -(-n // _LANES)                      # boxes packed 128 per lane-row
    if rows <= 8:
        rt = rows                               # single step, full-dim block
        rows_pad = rows
    else:
        # >= 2 grid steps (so both v7x TensorCores get work), rt a multiple
        # of 8, capped at row_tile.
        half = -(-rows // 2)
        cap = -(-half // 8) * 8
        rt = max(8, min(row_tile, cap))
        rows_pad = -(-rows // rt) * rt
    n_pad = rows_pad * _LANES
    grid = rows_pad // rt

    store_dtype = jnp.float32 if input_dtype is None else input_dtype

    def _prep(x):
        # pad with harmless unit boxes so padded lanes stay finite, then
        # de-interleave to SoA coordinate planes: (n_pad, 4) -> (4, rows, 128).
        # (Producers that already hold SoA planes can feed them directly and
        # skip this pass; allow_input_fusion lets XLA fold it into the DMA.)
        if n_pad != n:
            x = jnp.pad(x, ((0, n_pad - n), (0, 0)), constant_values=1.0)
        return x.T.reshape(4, rows_pad, _LANES).astype(store_dtype)

    p = _prep(pred)
    t = _prep(target)

    reduce_sum = reduction in ("mean", "sum")
    kernel = functools.partial(
        _iou_loss_kernel, loss_type=loss_type, xyxy=xyxy, n_valid=n,
        reduce_sum=reduce_sum, assume_positive_wh=assume_positive_wh)

    in_specs = [
        pl.BlockSpec((4, rt, _LANES), lambda i: (0, i, 0)),
        pl.BlockSpec((4, rt, _LANES), lambda i: (0, i, 0)),
    ]
    vmem_limit = 32 * 1024 * 1024

    if reduce_sum:
        # Resident (1, 128) accumulator output -> grid axis must be sequential.
        out_shape = jax.ShapeDtypeStruct((1, _LANES), jnp.float32)
        out_specs = pl.BlockSpec((1, _LANES), lambda i: (0, 0))
        cp = pltpu.CompilerParams(
            dimension_semantics=("arbitrary",),
            vmem_limit_bytes=vmem_limit)
    else:
        out_shape = jax.ShapeDtypeStruct((rows_pad, _LANES), jnp.float32)
        out_specs = pl.BlockSpec((rt, _LANES), lambda i: (i, 0))
        cp = pltpu.CompilerParams(
            dimension_semantics=("parallel",),
            vmem_limit_bytes=vmem_limit,
            allow_input_fusion=[True, True])

    out = pl.pallas_call(
        kernel,
        out_shape=out_shape,
        grid=(grid,),
        in_specs=in_specs,
        out_specs=out_specs,
        compiler_params=cp,
    )(p, t)

    if reduce_sum:
        total = jnp.sum(out)
        return total / n if reduction == "mean" else total
    return out.reshape(-1)[:n]


# ----------------------------------------------------------------------------
# pure-JAX references of the torch forward (xyxy=False)
# ----------------------------------------------------------------------------
def _reference(pred, target, loss_type="ciou"):
    pred = pred.reshape(-1, 4)
    target = target.reshape(-1, 4)
    tl = jnp.maximum(pred[:, :2] - pred[:, 2:] / 2, target[:, :2] - target[:, 2:] / 2)
    br = jnp.minimum(pred[:, :2] + pred[:, 2:] / 2, target[:, :2] + target[:, 2:] / 2)
    area_p = jnp.prod(pred[:, 2:], axis=1)
    area_g = jnp.prod(target[:, 2:], axis=1)
    hw = jnp.maximum(br - tl, 0.0)
    area_i = jnp.prod(hw, axis=1)
    iou = area_i / (area_p + area_g - area_i + 1e-16)
    c_tl = jnp.minimum(pred[:, :2] - pred[:, 2:] / 2, target[:, :2] - target[:, 2:] / 2)
    c_br = jnp.maximum(pred[:, :2] + pred[:, 2:] / 2, target[:, :2] + target[:, 2:] / 2)
    if loss_type == "iou":
        return 1.0 - iou ** 2
    if loss_type == "giou":
        area_c = jnp.prod(c_br - c_tl, axis=1)
        giou = iou - (area_c - area_i) / jnp.maximum(area_c, 1e-16)
        return 1.0 - jnp.clip(giou, -1.0, 1.0)
    # ciou
    convex_dis = (c_br[:, 0] - c_tl[:, 0]) ** 2 + (c_br[:, 1] - c_tl[:, 1]) ** 2 + 1e-7
    center_dis = (pred[:, 0] - target[:, 0]) ** 2 + (pred[:, 1] - target[:, 1]) ** 2
    v = 4 / math.pi ** 2 * (
        jnp.arctan(target[:, 2] / jnp.maximum(target[:, 3], 1e-7))
        - jnp.arctan(pred[:, 2] / jnp.maximum(pred[:, 3], 1e-7))
    ) ** 2
    alpha = v / (1 + 1e-7 - iou + v)
    ciou = iou - (center_dis / convex_dis + alpha * v)
    return 1.0 - jnp.clip(ciou, -1.0, 1.0)


def _make_boxes(key, n):
    k1, k2, k3, k4 = jax.random.split(key, 4)
    pred = jnp.concatenate(
        [jax.random.uniform(k1, (n, 2), jnp.float32, 0.0, 10.0),
         jax.random.uniform(k2, (n, 2), jnp.float32, 1.0, 5.0)], axis=1)
    target = jnp.concatenate(
        [jax.random.uniform(k3, (n, 2), jnp.float32, 0.0, 10.0),
         jax.random.uniform(k4, (n, 2), jnp.float32, 1.0, 5.0)], axis=1)
    return pred, target


if __name__ == "__main__":
    key = jax.random.PRNGKey(0)
    ka, kb, kc = jax.random.split(key, 3)

    # 1) tiny case: single grid step, partial lane-row
    N = 8
    pred, target = _make_boxes(ka, N)
    loss = jax.block_until_ready(iou_loss(pred, target, loss_type="ciou"))
    ref = _reference(pred, target, "ciou")
    assert loss.shape == (N,)
    assert bool(jnp.all(jnp.isfinite(loss)))
    assert jnp.allclose(loss, ref, atol=1e-4, rtol=1e-4), (loss, ref)

    # 2) a few lane-rows; all implemented loss branches
    N2 = 300
    pred2, target2 = _make_boxes(kb, N2)
    for lt in ("ciou", "iou", "giou"):
        out = jax.block_until_ready(iou_loss(pred2, target2, loss_type=lt))
        ref2 = _reference(pred2, target2, lt)
        assert out.shape == (N2,)
        assert bool(jnp.all(jnp.isfinite(out)))
        assert jnp.allclose(out, ref2, atol=1e-4, rtol=1e-4), lt

    # 3) multi-step grid (>= 2 steps -> exercises tiling, padding, megacore path)
    N3 = 2500
    pred3, target3 = _make_boxes(kc, N3)
    out3 = jax.block_until_ready(iou_loss(pred3, target3, loss_type="ciou"))
    ref3 = _reference(pred3, target3, "ciou")
    assert out3.shape == (N3,)
    assert bool(jnp.all(jnp.isfinite(out3)))
    assert jnp.allclose(out3, ref3, atol=1e-4, rtol=1e-4)

    # 4) in-kernel reductions (masked partial sums; no (N,) HBM round-trip)
    m = jax.block_until_ready(iou_loss(pred3, target3, reduction="mean"))
    s = jax.block_until_ready(iou_loss(pred3, target3, reduction="sum"))
    assert jnp.allclose(m, ref3.mean(), atol=1e-3, rtol=1e-4)
    assert jnp.allclose(s, ref3.sum(), atol=1e-2, rtol=1e-4)

    # 5) bf16 input path (halves input HBM traffic on memory-bound v5e/v6e)
    outb = jax.block_until_ready(
        iou_loss(pred3, target3, loss_type="ciou", input_dtype=jnp.bfloat16))
    assert outb.shape == (N3,)
    assert bool(jnp.all(jnp.isfinite(outb)))
    assert float(jnp.max(jnp.abs(outb - ref3))) < 0.1

    print("KERNEL_OK")
</pallas_src>

<mosaic_0001>
module attributes {stable_mosaic.version = 11 : i64} {
  func.func @_iou_loss_kernel(%arg0: i32, %arg1: memref<4x1x128xf32, #tpu.memory_space<vmem>>, %arg2: memref<4x1x128xf32, #tpu.memory_space<vmem>>, %arg3: memref<1x128xf32, #tpu.memory_space<vmem>>) attributes {dimension_semantics = [#tpu.dimension_semantics<parallel>], iteration_bounds = array<i64: 1>, scalar_prefetch = 0 : i64, scratch_operands = 0 : i64, tpu.core_type = #tpu.core_type<tc>, window_params = [{transform_indices = @transform_0, window_bounds = array<i64: 4, 1, 128>}, {transform_indices = @transform_1, window_bounds = array<i64: 4, 1, 128>}, {transform_indices = @transform_2, window_bounds = array<i64: 1, 128>}]} {
    %c0 = arith.constant 0 : index
    %c0_0 = arith.constant 0 : index
    %c0_1 = arith.constant 0 : index
    %0 = vector.load %arg1[%c0, %c0_0, %c0_1] : memref<4x1x128xf32, #tpu.memory_space<vmem>>, vector<1x1x128xf32>
    %1 = vector.shape_cast %0 : vector<1x1x128xf32> to vector<1x128xf32>
    %c1 = arith.constant 1 : index
    %c0_2 = arith.constant 0 : index
    %c0_3 = arith.constant 0 : index
    %2 = vector.load %arg1[%c1, %c0_2, %c0_3] : memref<4x1x128xf32, #tpu.memory_space<vmem>>, vector<1x1x128xf32>
    %3 = vector.shape_cast %2 : vector<1x1x128xf32> to vector<1x128xf32>
    %c2 = arith.constant 2 : index
    %c0_4 = arith.constant 0 : index
    %c0_5 = arith.constant 0 : index
    %4 = vector.load %arg1[%c2, %c0_4, %c0_5] : memref<4x1x128xf32, #tpu.memory_space<vmem>>, vector<1x1x128xf32>
    %5 = vector.shape_cast %4 : vector<1x1x128xf32> to vector<1x128xf32>
    %c3 = arith.constant 3 : index
    %c0_6 = arith.constant 0 : index
    %c0_7 = arith.constant 0 : index
    %6 = vector.load %arg1[%c3, %c0_6, %c0_7] : memref<4x1x128xf32, #tpu.memory_space<vmem>>, vector<1x1x128xf32>
    %7 = vector.shape_cast %6 : vector<1x1x128xf32> to vector<1x128xf32>
    %c0_8 = arith.constant 0 : index
    %c0_9 = arith.constant 0 : index
    %c0_10 = arith.constant 0 : index
    %8 = vector.load %arg2[%c0_8, %c0_9, %c0_10] : memref<4x1x128xf32, #tpu.memory_space<vmem>>, vector<1x1x128xf32>
    %9 = vector.shape_cast %8 : vector<1x1x128xf32> to vector<1x128xf32>
    %c1_11 = arith.constant 1 : index
    %c0_12 = arith.constant 0 : index
    %c0_13 = arith.constant 0 : index
    %10 = vector.load %arg2[%c1_11, %c0_12, %c0_13] : memref<4x1x128xf32, #tpu.memory_space<vmem>>, vector<1x1x128xf32>
    %11 = vector.shape_cast %10 : vector<1x1x128xf32> to vector<1x128xf32>
    %c2_14 = arith.constant 2 : index
    %c0_15 = arith.constant 0 : index
    %c0_16 = arith.constant 0 : index
    %12 = vector.load %arg2[%c2_14, %c0_15, %c0_16] : memref<4x1x128xf32, #tpu.memory_space<vmem>>, vector<1x1x128xf32>
    %13 = vector.shape_cast %12 : vector<1x1x128xf32> to vector<1x128xf32>
    %c3_17 = arith.constant 3 : index
    %c0_18 = arith.constant 0 : index
    %c0_19 = arith.constant 0 : index
    %14 = vector.load %arg2[%c3_17, %c0_18, %c0_19] : memref<4x1x128xf32, #tpu.memory_space<vmem>>, vector<1x1x128xf32>
    %15 = vector.shape_cast %14 : vector<1x1x128xf32> to vector<1x128xf32>
    %cst = arith.constant 5.000000e-01 : f32
    %16 = vector.broadcast %cst : f32 to vector<1x128xf32>
    %17 = arith.mulf %16, %5 : vector<1x128xf32>
    %18 = arith.subf %1, %17 : vector<1x128xf32>
    %cst_20 = arith.constant 5.000000e-01 : f32
    %19 = vector.broadcast %cst_20 : f32 to vector<1x128xf32>
    %20 = arith.mulf %19, %7 : vector<1x128xf32>
    %21 = arith.subf %3, %20 : vector<1x128xf32>
    %cst_21 = arith.constant 5.000000e-01 : f32
    %22 = vector.broadcast %cst_21 : f32 to vector<1x128xf32>
    %23 = arith.mulf %22, %5 : vector<1x128xf32>
    %24 = arith.addf %1, %23 : vector<1x128xf32>
    %cst_22 = arith.constant 5.000000e-01 : f32
    %25 = vector.broadcast %cst_22 : f32 to vector<1x128xf32>
    %26 = arith.mulf %25, %7 : vector<1x128xf32>
    %27 = arith.addf %3, %26 : vector<1x128xf32>
    %cst_23 = arith.constant 5.000000e-01 : f32
    %28 = vector.broadcast %cst_23 : f32 to vector<1x128xf32>
    %29 = arith.mulf %28, %13 : vector<1x128xf32>
    %30 = arith.subf %9, %29 : vector<1x128xf32>
    %cst_24 = arith.constant 5.000000e-01 : f32
    %31 = vector.broadcast %cst_24 : f32 to vector<1x128xf32>
    %32 = arith.mulf %31, %15 : vector<1x128xf32>
    %33 = arith.subf %11, %32 : vector<1x128xf32>
    %cst_25 = arith.constant 5.000000e-01 : f32
    %34 = vector.broadcast %cst_25 : f32 to vector<1x128xf32>
    %35 = arith.mulf %34, %13 : vector<1x128xf32>
    %36 = arith.addf %9, %35 : vector<1x128xf32>
    %cst_26 = arith.constant 5.000000e-01 : f32
    %37 = vector.broadcast %cst_26 : f32 to vector<1x128xf32>
    %38 = arith.mulf %37, %15 : vector<1x128xf32>
    %39 = arith.addf %11, %38 : vector<1x128xf32>
    %40 = arith.maximumf %18, %30 : vector<1x128xf32>
    %41 = arith.maximumf %21, %33 : vector<1x128xf32>
    %42 = arith.minimumf %24, %36 : vector<1x128xf32>
    %43 = arith.minimumf %27, %39 : vector<1x128xf32>
    %44 = arith.mulf %5, %7 : vector<1x128xf32>
    %45 = arith.mulf %13, %15 : vector<1x128xf32>
    %46 = arith.subf %42, %40 : vector<1x128xf32>
    %cst_27 = arith.constant 0.000000e+00 : f32
    %47 = vector.broadcast %cst_27 : f32 to vector<1x128xf32>
    %48 = arith.maximumf %46, %47 : vector<1x128xf32>
    %49 = arith.subf %43, %41 : vector<1x128xf32>
    %cst_28 = arith.constant 0.000000e+00 : f32
    %50 = vector.broadcast %cst_28 : f32 to vector<1x128xf32>
    %51 = arith.maximumf %49, %50 : vector<1x128xf32>
    %52 = arith.mulf %48, %51 : vector<1x128xf32>
    %53 = arith.addf %44, %45 : vector<1x128xf32>
    %54 = arith.subf %53, %52 : vector<1x128xf32>
    %cst_29 = arith.constant 1.000000e-16 : f32
    %55 = vector.broadcast %cst_29 : f32 to vector<1x128xf32>
    %56 = arith.addf %54, %55 : vector<1x128xf32>
    %57 = tpu.reciprocal %56 {approx = true} : vector<1x128xf32> -> vector<1x128xf32>
    %58 = arith.mulf %56, %57 : vector<1x128xf32>
    %cst_30 = arith.constant 2.000000e+00 : f32
    %59 = vector.broadcast %cst_30 : f32 to vector<1x128xf32>
    %60 = arith.subf %59, %58 : vector<1x128xf32>
    %61 = arith.mulf %57, %60 : vector<1x128xf32>
    %62 = arith.mulf %52, %61 : vector<1x128xf32>
    %63 = arith.minimumf %18, %30 : vector<1x128xf32>
    %64 = arith.minimumf %21, %33 : vector<1x128xf32>
    %65 = arith.maximumf %24, %36 : vector<1x128xf32>
    %66 = arith.maximumf %27, %39 : vector<1x128xf32>
    %67 = arith.subf %65, %63 : vector<1x128xf32>
    %68 = arith.subf %66, %64 : vector<1x128xf32>
    %69 = arith.mulf %67, %67 : vector<1x128xf32>
    %70 = arith.mulf %68, %68 : vector<1x128xf32>
    %71 = arith.addf %69, %70 : vector<1x128xf32>
    %cst_31 = arith.constant 1.000000e-07 : f32
    %72 = vector.broadcast %cst_31 : f32 to vector<1x128xf32>
    %73 = arith.addf %71, %72 : vector<1x128xf32>
    %74 = arith.subf %1, %9 : vector<1x128xf32>
    %75 = arith.subf %3, %11 : vector<1x128xf32>
    %76 = arith.mulf %74, %74 : vector<1x128xf32>
    %77 = arith.mulf %75, %75 : vector<1x128xf32>
    %78 = arith.addf %76, %77 : vector<1x128xf32>
    %cst_32 = arith.constant 1.000000e-07 : f32
    %79 = vector.broadcast %cst_32 : f32 to vector<1x128xf32>
    %80 = arith.maximumf %15, %79 : vector<1x128xf32>
    %cst_33 = arith.constant 1.000000e-07 : f32
    %81 = vector.broadcast %cst_33 : f32 to vector<1x128xf32>
    %82 = arith.maximumf %7, %81 : vector<1x128xf32>
    %83 = arith.mulf %13, %82 : vector<1x128xf32>
    %84 = arith.mulf %5, %80 : vector<1x128xf32>
    %85 = arith.subf %83, %84 : vector<1x128xf32>
    %86 = arith.mulf %80, %82 : vector<1x128xf32>
    %87 = arith.mulf %13, %5 : vector<1x128xf32>
    %88 = arith.addf %86, %87 : vector<1x128xf32>
    %89 = tpu.reciprocal %88 {approx = true} : vector<1x128xf32> -> vector<1x128xf32>
    %90 = arith.mulf %88, %89 : vector<1x128xf32>
    %cst_34 = arith.constant 2.000000e+00 : f32
    %91 = vector.broadcast %cst_34 : f32 to vector<1x128xf32>
    %92 = arith.subf %91, %90 : vector<1x128xf32>
    %93 = arith.mulf %89, %92 : vector<1x128xf32>
    %94 = arith.mulf %85, %93 : vector<1x128xf32>
    %cst_35 = arith.constant 0.000000e+00 : f32
    %95 = vector.broadcast %cst_35 : f32 to vector<1x128xf32>
    %96 = arith.cmpf olt, %94, %95 : vector<1x128xf32>
    %cst_36 = arith.constant -1.000000e+00 : f32
    %cst_37 = arith.constant 1.000000e+00 : f32
    %97 = vector.broadcast %cst_36 : f32 to vector<1x128xf32>
    %98 = vector.broadcast %cst_37 : f32 to vector<1x128xf32>
    %99 = arith.select %96, %97, %98 : vector<1x128xi1>, vector<1x128xf32>
    %100 = math.absf %94 : vector<1x128xf32>
    %cst_38 = arith.constant 2.41421366 : f32
    %101 = vector.broadcast %cst_38 : f32 to vector<1x128xf32>
    %102 = arith.cmpf ogt, %100, %101 : vector<1x128xf32>
    %cst_39 = arith.constant 0.414213568 : f32
    %103 = vector.broadcast %cst_39 : f32 to vector<1x128xf32>
    %104 = arith.cmpf ogt, %100, %103 : vector<1x128xf32>
    %cst_40 = arith.constant dense<true> : vector<1x128xi1>
    %105 = arith.xori %102, %cst_40 : vector<1x128xi1>
    %106 = arith.andi %104, %105 : vector<1x128xi1>
    %cst_41 = arith.constant 1.000000e+00 : f32
    %107 = vector.broadcast %cst_41 : f32 to vector<1x128xf32>
    %108 = arith.addf %100, %107 : vector<1x128xf32>
    %109 = arith.select %102, %100, %108 : vector<1x128xi1>, vector<1x128xf32>
    %110 = tpu.reciprocal %109 {approx = true} : vector<1x128xf32> -> vector<1x128xf32>
    %111 = arith.mulf %109, %110 : vector<1x128xf32>
    %cst_42 = arith.constant 2.000000e+00 : f32
    %112 = vector.broadcast %cst_42 : f32 to vector<1x128xf32>
    %113 = arith.subf %112, %111 : vector<1x128xf32>
    %114 = arith.mulf %110, %113 : vector<1x128xf32>
    %cst_43 = arith.constant 0.000000e+00 : f32
    %115 = vector.broadcast %cst_43 : f32 to vector<1x128xf32>
    %116 = arith.subf %115, %114 : vector<1x128xf32>
    %cst_44 = arith.constant 1.000000e+00 : f32
    %117 = vector.broadcast %cst_44 : f32 to vector<1x128xf32>
    %118 = arith.subf %100, %117 : vector<1x128xf32>
    %119 = arith.mulf %118, %114 : vector<1x128xf32>
    %120 = arith.select %106, %119, %100 : vector<1x128xi1>, vector<1x128xf32>
    %121 = arith.select %102, %116, %120 : vector<1x128xi1>, vector<1x128xf32>
    %cst_45 = arith.constant 0.785398185 : f32
    %cst_46 = arith.constant 0.000000e+00 : f32
    %122 = vector.broadcast %cst_45 : f32 to vector<1x128xf32>
    %123 = vector.broadcast %cst_46 : f32 to vector<1x128xf32>
    %124 = arith.select %106, %122, %123 : vector<1x128xi1>, vector<1x128xf32>
    %cst_47 = arith.constant 1.57079637 : f32
    %125 = vector.broadcast %cst_47 : f32 to vector<1x128xf32>
    %126 = arith.select %102, %125, %124 : vector<1x128xi1>, vector<1x128xf32>
    %127 = arith.mulf %121, %121 : vector<1x128xf32>
    %cst_48 = arith.constant 0.0805374458 : f32
    %128 = vector.broadcast %cst_48 : f32 to vector<1x128xf32>
    %129 = arith.mulf %128, %127 : vector<1x128xf32>
    %cst_49 = arith.constant 0.138776854 : f32
    %130 = vector.broadcast %cst_49 : f32 to vector<1x128xf32>
    %131 = arith.subf %129, %130 : vector<1x128xf32>
    %132 = arith.mulf %131, %127 : vector<1x128xf32>
    %cst_50 = arith.constant 0.199777111 : f32
    %133 = vector.broadcast %cst_50 : f32 to vector<1x128xf32>
    %134 = arith.addf %132, %133 : vector<1x128xf32>
    %135 = arith.mulf %134, %127 : vector<1x128xf32>
    %cst_51 = arith.constant 0.333329499 : f32
    %136 = vector.broadcast %cst_51 : f32 to vector<1x128xf32>
    %137 = arith.subf %135, %136 : vector<1x128xf32>
    %138 = arith.mulf %137, %127 : vector<1x128xf32>
    %139 = arith.mulf %138, %121 : vector<1x128xf32>
    %140 = arith.addf %126, %139 : vector<1x128xf32>
    %141 = arith.addf %140, %121 : vector<1x128xf32>
    %142 = arith.mulf %99, %141 : vector<1x128xf32>
    %cst_52 = arith.constant 0.405284733 : f32
    %143 = vector.broadcast %cst_52 : f32 to vector<1x128xf32>
    %144 = arith.mulf %143, %142 : vector<1x128xf32>
    %145 = arith.mulf %144, %142 : vector<1x128xf32>
    %cst_53 = arith.constant 1.00000012 : f32
    %146 = vector.broadcast %cst_53 : f32 to vector<1x128xf32>
    %147 = arith.subf %146, %62 : vector<1x128xf32>
    %148 = arith.addf %147, %145 : vector<1x128xf32>
    %149 = tpu.reciprocal %148 {approx = true} : vector<1x128xf32> -> vector<1x128xf32>
    %150 = arith.mulf %148, %149 : vector<1x128xf32>
    %cst_54 = arith.constant 2.000000e+00 : f32
    %151 = vector.broadcast %cst_54 : f32 to vector<1x128xf32>
    %152 = arith.subf %151, %150 : vector<1x128xf32>
    %153 = arith.mulf %149, %152 : vector<1x128xf32>
    %154 = arith.mulf %145, %153 : vector<1x128xf32>
    %155 = tpu.reciprocal %73 {approx = true} : vector<1x128xf32> -> vector<1x128xf32>
    %156 = arith.mulf %73, %155 : vector<1x128xf32>
    %cst_55 = arith.constant 2.000000e+00 : f32
    %157 = vector.broadcast %cst_55 : f32 to vector<1x128xf32>
    %158 = arith.subf %157, %156 : vector<1x128xf32>
    %159 = arith.mulf %155, %158 : vector<1x128xf32>
    %160 = arith.mulf %78, %159 : vector<1x128xf32>
    %161 = arith.mulf %154, %145 : vector<1x128xf32>
    %162 = arith.addf %160, %161 : vector<1x128xf32>
    %163 = arith.subf %62, %162 : vector<1x128xf32>
    %cst_56 = arith.constant -1.000000e+00 : f32
    %cst_57 = arith.constant 1.000000e+00 : f32
    %164 = vector.broadcast %cst_56 : f32 to vector<1x128xf32>
    %165 = arith.maximumf %164, %163 : vector<1x128xf32>
    %166 = vector.broadcast %cst_57 : f32 to vector<1x128xf32>
    %167 = arith.minimumf %166, %165 : vector<1x128xf32>
    %cst_58 = arith.constant 1.000000e+00 : f32
    %168 = vector.broadcast %cst_58 : f32 to vector<1x128xf32>
    %169 = arith.subf %168, %167 : vector<1x128xf32>
    %c0_59 = arith.constant 0 : index
    %c0_60 = arith.constant 0 : index
    %170 = vector.load %arg3[%c0_59, %c0_60] : memref<1x128xf32, #tpu.memory_space<vmem>>, vector<1x128xf32>
    tpu.vector_store %arg3[%c0_59, %c0_60], %169 {strides = array<i32>} : memref<1x128xf32, #tpu.memory_space<vmem>>, vector<1x128xf32>,
    return
  }
  func.func @transform_0(%arg0: i32) -> (i32, i32, i32) {
    %c0_i32 = arith.constant 0 : i32
    %c0_i32_0 = arith.constant 0 : i32
    %c0_i32_1 = arith.constant 0 : i32
    return %c0_i32, %arg0, %c0_i32_0 : i32, i32, i32
  }
  func.func @transform_1(%arg0: i32) -> (i32, i32, i32) {
    %c0_i32 = arith.constant 0 : i32
    %c0_i32_0 = arith.constant 0 : i32
    %c0_i32_1 = arith.constant 0 : i32
    return %c0_i32, %arg0, %c0_i32_0 : i32, i32, i32
  }
  func.func @transform_2(%arg0: i32) -> (i32, i32) {
    %c0_i32 = arith.constant 0 : i32
    %c0_i32_0 = arith.constant 0 : i32
    return %arg0, %c0_i32 : i32, i32
  }
}

</mosaic_0001>

<bundles_post_ra>
// kernel: tpu_custom_call.1
= control target key start
LH: loop header
LB: loop body
LE: loop exit
PB: predicated region body
PF: predicated region fallthrough
CT: control target
= control target key end

     0   :  { %7 = vsyncpa [#allocation3], 0  ;;  %s367_s0 = inlined_call_operand.hbm [shape: f32[4,1,128], index: 0, kind: input, shape index: {}]   ;;  %s368_s1 = inlined_call_operand.hbm [shape: f32[4,1,128], index: 1, kind: input, shape index: {}]   ;;  %s369_s2 = inlined_call_operand.hbm [shape: f32[1,128], index: 2, kind: output, shape index: {}]  }
   0x1   :  { %8 = vsyncpa [#allocation6], 0 }
   0x2   :  { %9 = vsyncpa [#allocation4], 0  ;;  %s276_s9 = smov [#allocation2]   ;;  %s204_s13 = scalar_lea.hbm %s367_s0, 64 }
   0x3   :  { %s15_s10 = sshll.u32 %s276_s9, 4  ;;  %p205_p0 = scmp.ne.s32.totalorder %s367_s0, %s204_s13  ;;  %s16_s10 = int_to_ptr.vmem [resolvable:$true] %s15_s10 }
   0x4   :  { %p208_p1 = scmp.lt.u32.totalorder %s204_s13, %s367_s0 }
   0x6   :  { %p210_p2 = pnand %p208_p1, %p205_p0 }
   0x8   :  { %213 = shalt.err (!%p210_p2)
}
   0x9   :  { %s214_s18 = scalar_lea.vmem %s16_s10, 64  ;;  %p219_p4 = scmp.lt.s32.totalorder %s16_s10, %s16_s10 }
   0xa   :  { %p215_p3 = scmp.ne.s32.totalorder %s16_s10, %s214_s18  ;;  %p220_p5 = scmp.lt.s32.totalorder %s214_s18, %s214_s18 }
   0xc   :  { %p221_p6 = por %p220_p5, %p219_p4 }
   0xe   :  { %p222_p7 = pnand %p221_p6, %p215_p3 }
  0x10   :  { %225 = shalt.err (!%p222_p7)
}
  0x11   :  { %s277_s19 = smov 16   ;;  %s278_s20 = smov 1  }
  0x12   :  { %21 = dma.hbm_to_vmem [thread:$0]  %s367_s0, 64, %s16_s10, [#allocation3], %s277_s19, %s277_s19, %s278_s20  }
  0x13   :  { %s279_s23 = smov [#allocation5]   ;;  %s226_s27 = scalar_lea.hbm %s368_s1, 64 }
  0x14   :  { %s27_s24 = sshll.u32 %s279_s23, 4  ;;  %p227_p8 = scmp.ne.s32.totalorder %s368_s1, %s226_s27  ;;  %s28_s24 = int_to_ptr.vmem [resolvable:$true] %s27_s24 }
  0x15   :  { %p230_p9 = scmp.lt.u32.totalorder %s226_s27, %s368_s1 }
  0x17   :  { %p232_p10 = pnand %p230_p9, %p227_p8 }
  0x19   :  { %235 = shalt.err (!%p232_p10)
}
  0x1a   :  { %s236_s4 = scalar_lea.vmem %s28_s24, 64  ;;  %p241_p12 = scmp.lt.s32.totalorder %s28_s24, %s28_s24 }
  0x1b   :  { %p237_p11 = scmp.ne.s32.totalorder %s28_s24, %s236_s4  ;;  %p242_p13 = scmp.lt.s32.totalorder %s236_s4, %s236_s4 }
  0x1d   :  { %p243_p0 = por %p242_p13, %p241_p12 }
  0x1f   :  { %p244_p1 = pnand %p243_p0, %p237_p11 }
  0x21   :  { %247 = shalt.err (!%p244_p1)
}
  0x22   :  { %33 = dma.hbm_to_vmem [thread:$0]  %s368_s1, 64, %s28_s24, [#allocation6], %s277_s19, %s277_s19, %s278_s20  }
  0x23   :  { %270 = dma.done.wait [#allocation3], 64  }
  0x24   :  { %271 = vsyncadd [#allocation3], 4294967232 }
  0x25   :  { %272 = dma.done.wait [#allocation6], 64  }
  0x26   :  { %273 = vsyncadd [#allocation6], 4294967232  ;;  %v53_v0 = vld [vmem:[#allocation5 + $0x3] sm:$0x1]  ;;  %v46_v1 = vld [vmem:[#allocation2 + $0x3] sm:$0x1] }
  0x27   :  { %v44_v2 = vld [vmem:[#allocation2 + $0x2] sm:$0x1]  ;;  %v51_v3 = vld [vmem:[#allocation5 + $0x2] sm:$0x1]  ;;  %v100_v4 = vmax.f32 %v53_v0, 1e-07 }
  0x28   :  { %v101_v5 = vmax.f32 %v46_v1, 1e-07  ;;  %v106_v6 = vmul.f32 %v51_v3, %v44_v2  ;;  %v54_v9 = vmul.f32 0.5, %v44_v2  ;;  %v323_v10 = vld [vmem:[#allocation2] sm:$0x1]  ;;  %v56_v11 = vmul.f32 0.5, %v46_v1 }
  0x29   :  { %v325_v12 = vld [vmem:[#allocation2 + $0x1] sm:$0x1]  ;;  %v60_v13 = vmul.f32 0.5, %v51_v3  ;;  %v62_v14 = vmul.f32 0.5, %v53_v0  ;;  %v327_v15 = vld [vmem:[#allocation5] sm:$0x1]  ;;  %v103_v18 = vmul.f32 %v100_v4, %v44_v2  ;;  %v70_v41 = vmul.f32 %v46_v1, %v44_v2 }
  0x2a   :  { %v105_v7 = vmul.f32 %v101_v5, %v100_v4  ;;  %v329_v16 = vld [vmem:[#allocation5 + $0x1] sm:$0x1]  ;;  %v102_v17 = vmul.f32 %v101_v5, %v51_v3  ;;  %v55_v20 = vsub.f32 %v323_v10, %v54_v9  ;;  %v57_v21 = vsub.f32 %v325_v12, %v56_v11  ;;  %s283_s1 = smov [#allocation7]  }
  0x2b   :  { %v58_v22 = vadd.f32 %v54_v9, %v323_v10  ;;  %v59_v23 = vadd.f32 %v56_v11, %v325_v12  ;;  %v61_v25 = vsub.f32 %v327_v15, %v60_v13  ;;  %v63_v26 = vsub.f32 %v329_v16, %v62_v14  ;;  %s172_s6 = sshll.u32 %s283_s1, 4  ;;  %s173_s6 = int_to_ptr.vmem [resolvable:$true] %s172_s6 }
  0x2c   :  { %v107_v8 = vadd.f32 %v106_v6, %v105_v7  ;;  %v64_v27 = vadd.f32 %v60_v13, %v327_v15  ;;  %v65_v28 = vadd.f32 %v62_v14, %v329_v16  ;;  %v104_v29 = vsub.f32 %v102_v17, %v103_v18  ;;  %s248_s7 = scalar_lea.vmem %s173_s6, 16  ;;  %s252_s8 = scalar_lea.vmem %s173_s6, 32 }
  0x2d   :  { %v66_v32 = vmax.f32 %v55_v20, %v61_v25  ;;  %v67_v33 = vmax.f32 %v57_v21, %v63_v26  ;;  %v71_v43 = vmul.f32 %v53_v0, %v51_v3  ;;  %vm280_vm2 = vmmov 1   ;;  %p249_p2 = scmp.ne.s32.totalorder %s173_s6, %s248_s7  ;;  %p253_p3 = scmp.lt.s32.totalorder %s173_s6, %s173_s6 }
  0x2e   :  { %194 = vrcp.f32 %v107_v8  ;;  %v68_v34 = vmin.f32 %v58_v22, %v64_v27  ;;  %v69_v35 = vmin.f32 %v59_v23, %v65_v28  ;;  %v85_v61 = vmin.f32 %v55_v20, %v61_v25  ;;  %p254_p4 = scmp.lt.s32.totalorder %s252_s8, %s248_s7 }
  0x2f   :  { %v77_v47 = vadd.f32 %v71_v43, %v70_v41  ;;  %v86_v62 = vmin.f32 %v57_v21, %v63_v26  ;;  %v87_v63 = vmax.f32 %v58_v22, %v64_v27  ;;  %v88_v0 = vmax.f32 %v59_v23, %v65_v28 }
  0x30   :  { %v72_v38 = vsub.f32 %v68_v34, %v66_v32  ;;  %v74_v39 = vsub.f32 %v69_v35, %v67_v33  ;;  %v281_v17 = vmov 0.0   ;;  %v282_v27 = vmov 1.0   ;;  %p255_p5 = por %p254_p4, %p253_p3 }
  0x31   :  { %v89_v4 = vsub.f32 %v87_v63, %v85_v61  ;;  %v90_v5 = vsub.f32 %v88_v0, %v86_v62 }
  0x32   :  { %v73_v44 = vmax.f32 %v72_v38, 0.0  ;;  %v75_v45 = vmax.f32 %v74_v39, 0.0  ;;  %p256_p6 = pnand %p255_p5, %p249_p2 }
  0x33   :  { %v91_v9 = vmul.f32 %v89_v4, %v89_v4  ;;  %v92_v11 = vmul.f32 %v90_v5, %v90_v5 }
  0x34   :  { %v76_v46 = vmul.f32 %v75_v45, %v73_v44 }
  0x35   :  { %v93_v20 = vadd.f32 %v92_v11, %v91_v9 }
  0x36   :  { %v78_v48 = vsub.f32 %v77_v47, %v76_v46 }
  0x37   :  { %v94_v25 = vadd.f32 1e-07, %v93_v20 }
  0x38   :  { %v195_v19 = vpop.eup %194  ;;  %v79_v51 = vadd.f32 1e-16, %v78_v48 }
  0x39   :  { %v109_v24 = vmul.f32 %v195_v19, %v107_v8 }
  0x3b   :  { %v110_v30 = vsub.f32 2.0, %v109_v24 }
  0x3d   :  { %v111_v31 = vmul.f32 %v195_v19, %v110_v30 }
  0x3f   :  { %v112_v36 = vmul.f32 %v111_v31, %v104_v29 }
  0x41   :  { %v115_v37 = vand.u32 2147483647, %v112_v36  ;;  %vm113_vm5 = vcmp.lt.f32.partialorder %v112_v36, 0.0  ;;  %v96_v36 = vsub.f32 %v325_v12, %v329_v16 }
  0x42   :  { %v114_v28 = vsel %vm113_vm5, -1.0, %v282_v27 }
  0x43   :  { %vm116_vm0 = vcmp.gt.f32.partialorder %v115_v37, 2.4142137  ;;  %v120_v40 = vadd.f32 1.0, %v115_v37  ;;  %vm117_vm1 = vcmp.gt.f32.partialorder %v115_v37, 0.41421357  ;;  %v182_v53 = vadd.f32 -1.0, %v115_v37 }
  0x44   :  { %vm118_vm3 = vmxor %vm116_vm0, %vm280_vm2  ;;  %v98_v41 = vmul.f32 %v96_v36, %v96_v36 }
  0x45   :  { %v121_v42 = vsel %vm116_vm0, %v115_v37, %v120_v40  ;;  %vm341_vm4 = vmand %vm117_vm1, %vm118_vm3 }
  0x46   :  { %196 = vrcp.f32 %v121_v42  ;;  %v131_v18 = vsel %vm341_vm4, 0.7853982, %v281_v17 }
  0x47   :  { %198 = vrcp.f32 %v79_v51  ;;  %v132_v22 = vsel %vm116_vm0, 1.5707964, %v131_v18 }
  0x48   :  { %200 = vrcp.f32 %v94_v25 }
  0x50   :  { %v197_v49 = vpop.eup %196 }
  0x51   :  { %v123_v50 = vmul.f32 %v197_v49, %v121_v42  ;;  %v199_v3 = vpop.eup %198 }
  0x52   :  { %v81_v7 = vmul.f32 %v199_v3, %v79_v51  ;;  %v201_v38 = vpop.eup %200 }
  0x53   :  { %v124_v52 = vsub.f32 2.0, %v123_v50  ;;  %v155_v39 = vmul.f32 %v201_v38, %v94_v25 }
  0x54   :  { %v82_v14 = vsub.f32 2.0, %v81_v7 }
  0x55   :  { %v125_v54 = vmul.f32 %v197_v49, %v124_v52  ;;  %v156_v42 = vsub.f32 2.0, %v155_v39 }
  0x56   :  { %v83_v23 = vmul.f32 %v199_v3, %v82_v14 }
  0x57   :  { %v126_v56 = vsub.f32 0.0, %v125_v54  ;;  %v128_v57 = vmul.f32 %v182_v53, %v125_v54  ;;  %v157_v47 = vmul.f32 %v201_v38, %v156_v42 }
  0x58   :  { %v84_v29 = vmul.f32 %v83_v23, %v76_v46 }
  0x59   :  { %v129_v58 = vsel %vm341_vm4, %v128_v57, %v115_v37  ;;  %v95_v37 = vsub.f32 %v323_v10, %v327_v15 }
  0x5a   :  { %v130_v59 = vsel %vm116_vm0, %v126_v56, %v129_v58  ;;  %v147_v33 = vsub.f32 1.0000001, %v84_v29 }
  0x5b   :  { %v133_v60 = vmul.f32 %v130_v59, %v130_v59  ;;  %v97_v40 = vmul.f32 %v95_v37, %v95_v37 }
  0x5d   :  { %v134_v1 = vmul.f32 0.080537446, %v133_v60  ;;  %v99_v45 = vadd.f32 %v98_v41, %v97_v40 }
  0x5f   :  { %v183_v2 = vadd.f32 -0.13877685, %v134_v1  ;;  %v158_v50 = vmul.f32 %v157_v47, %v99_v45 }
  0x61   :  { %v136_v6 = vmul.f32 %v183_v2, %v133_v60 }
  0x63   :  { %v137_v8 = vadd.f32 0.19977711, %v136_v6 }
  0x65   :  { %v138_v13 = vmul.f32 %v137_v8, %v133_v60 }
  0x67   :  { %v184_v19 = vadd.f32 -0.3333295, %v138_v13 }
  0x69   :  { %v140_v21 = vmul.f32 %v184_v19, %v133_v60 }
  0x6b   :  { %v141_v24 = vmul.f32 %v140_v21, %v130_v59 }
  0x6d   :  { %v142_v26 = vadd.f32 %v141_v24, %v132_v22 }
  0x6f   :  { %v143_v30 = vadd.f32 %v142_v26, %v130_v59 }
  0x71   :  { %v144_v31 = vmul.f32 %v143_v30, %v114_v28 }
  0x73   :  { %v145_v32 = vmul.f32 0.40528473, %v144_v31 }
  0x75   :  { %v146_v34 = vmul.f32 %v145_v32, %v144_v31 }
  0x77   :  { %v148_v35 = vadd.f32 %v147_v33, %v146_v34 }
  0x79   :  { %202 = vrcp.f32 %v148_v35 }
  0x83   :  { %v203_v43 = vpop.eup %202 }
  0x84   :  { %v150_v44 = vmul.f32 %v203_v43, %v148_v35 }
  0x86   :  { %v151_v46 = vsub.f32 2.0, %v150_v44 }
  0x88   :  { %v152_v48 = vmul.f32 %v203_v43, %v151_v46 }
  0x8a   :  { %v153_v49 = vmul.f32 %v152_v48, %v146_v34 }
  0x8c   :  { %v159_v51 = vmul.f32 %v153_v49, %v146_v34 }
  0x8e   :  { %v160_v52 = vadd.f32 %v159_v51, %v158_v50 }
  0x90   :  { %v161_v53 = vsub.f32 %v84_v29, %v160_v52 }
  0x92   :  { %v185_v10 = vclamps-f32 %v161_v53, 1.0 }
  0x94   :  { %v164_v15 = vsub.f32 1.0, %v185_v10 }
  0x96   :  { %165 = vst [vmem:[#allocation7] sm:$0x1] %v164_v15 }
  0x97   :  { %259 = shalt.err (!%p256_p6)
}
  0x98   :  { %s260_s11 = scalar_lea.hbm %s369_s2, 16 }
  0x99   :  { %p261_p7 = scmp.ne.s32.totalorder %s369_s2, %s260_s11  ;;  %p264_p8 = scmp.lt.u32.totalorder %s260_s11, %s369_s2 }
  0x9b   :  { %p266_p9 = pnand %p264_p8, %p261_p7 }
  0x9d   :  { %269 = shalt.err (!%p266_p9)
}
  0x9e   :  { %175 = dma.vmem_to_hbm [thread:$0]  %s173_s6, 16, %s369_s2, [#allocation4]  }
  0x9f   :  { %274 = dma.done.wait [#allocation4], 16  }
  0xa0   :  { %275 = vsyncadd [#allocation4], 4294967280 }
  0xa1   :  { %179 = vsyncpa [#allocation3], 1 }
  0xa2   :  { %180 = vsyncpa [#allocation6], 1 }
  0xa3   :  { %181 = vsyncpa [#allocation4], 1 }

</bundles_post_ra>
